<compile_context>
chip_gen: v5e
topology: v5e:2x2
jax: 0.10.0
libtpu: 0.0.40
codegen_flags: <defaults>
</compile_context>

<pallas_src>
import functools
import math

import jax
import jax.numpy as jnp
from jax.experimental import pallas as pl
from jax.experimental.pallas import tpu as pltpu

# ----------------------------- config (small) -------------------------------
NUM_CLASSES = 3
HIDDEN = 32          # shrunk from 768
SEQ = 8
BATCH = 2
VOCAB = 64
SEP_ID = 5           # stand-in for 102
DIS_LAMBDA = 0.5
CONCAT = False
ANNEAL = False


def kl_coef(i):
    return (math.tanh((i - 3500) / 1000) + 1) / 2


# ------------------------- BlockSpec helpers (no grid) -----------------------
_VMEM = functools.partial(pl.BlockSpec, memory_space=pltpu.MemorySpace.VMEM)
_SMEM = functools.partial(pl.BlockSpec, memory_space=pltpu.MemorySpace.SMEM)


# --------------------------- in-kernel helpers -------------------------------
def _log_softmax_rows(x):
    m = jnp.max(x, axis=-1, keepdims=True)
    return x - (m + jnp.log(jnp.sum(jnp.exp(x - m), axis=-1, keepdims=True)))


def _disc_log_prob(x, w0, b0, w1, b1, w2, b2):
    # DomainDiscriminator.forward: hidden_layers[0], hidden_layers[1]
    # (Linear + ReLU) then the final Linear, then log_softmax over classes.
    # TODO(synk): nn.Dropout(p=0.1) skipped (deterministic / eval mode).
    h = jnp.dot(x, w0, preferred_element_type=jnp.float32) + b0
    h = jnp.maximum(h, 0.0)
    h = jnp.dot(h, w1, preferred_element_type=jnp.float32) + b1
    h = jnp.maximum(h, 0.0)
    logits = jnp.dot(h, w2, preferred_element_type=jnp.float32) + b2
    return _log_softmax_rows(logits)


def _span_logits(h, wq, b_start, b_end):
    # h: (B, S, H) f32, wq: (2, H) (PyTorch Linear layout), biases: SMEM scalars.
    # start = qa_outputs channel 0, end = channel 1 (same as logits.split(1,-1)).
    ws = wq[0:1, :].reshape(1, 1, -1)                     # (1, 1, H)
    we = wq[1:2, :].reshape(1, 1, -1)
    start = jnp.sum(h * ws, axis=-1) + b_start            # (B, S) lane-dense
    end = jnp.sum(h * we, axis=-1) + b_end                # (B, S) lane-dense
    return start, end


# ------------------------------ Pallas kernels -------------------------------
def _qa_logits_kernel(h_ref, wqa_ref, bqa_ref, start_ref, end_ref):
    # Default forward mode: two lane-dense (B, S) outputs, no post-kernel slicing.
    start, end = _span_logits(h_ref[...], wqa_ref[...], bqa_ref[0], bqa_ref[1])
    start_ref[...] = start
    end_ref[...] = end


def _qa_total_loss_kernel(sp_ref, ep_ref, h_ref, dis_ref, wqa_ref, bqa_ref,
                          w0_ref, b0_ref, w1_ref, b1_ref, w2_ref, b2_ref,
                          loss_ref, *, dis_lambda, num_classes):
    # Fully fused forward_qa: discriminator + KLD + span logits + masked CE.
    h = h_ref[...]                                        # (B, S, H)
    B, S, _ = h.shape

    # --- discriminator on CLS embedding + KLDivLoss(batchmean) vs. uniform ----
    log_prob = _disc_log_prob(dis_ref[...], w0_ref[...], b0_ref[...],
                              w1_ref[...], b1_ref[...], w2_ref[...], b2_ref[...])
    t = 1.0 / num_classes
    kld = dis_lambda * jnp.sum(t * (math.log(t) - log_prob)) * (1.0 / B)

    # --- qa span logits (start = channel 0, end = channel 1) ------------------
    start_logits, end_logits = _span_logits(h, wqa_ref[...], bqa_ref[0], bqa_ref[1])

    col = jax.lax.broadcasted_iota(jnp.int32, (1, S), 1)  # hoisted, reused

    def masked_ce(logits, pos_ref):
        # CrossEntropyLoss(ignore_index=S), mean over valid rows.
        logp = _log_softmax_rows(logits)                  # (B, S)
        tot = jnp.zeros((1, 1), jnp.float32)
        cnt = jnp.zeros((1, 1), jnp.float32)
        for b in range(B):                                # tiny static B -> unrolled
            pos = jnp.clip(pos_ref[b], 0, S)              # positions.clamp_(0, S)
            valid = (pos < S).astype(jnp.float32)
            onehot = (col == pos).astype(jnp.float32)     # pos == S -> all zeros
            picked = jnp.sum(onehot * logp[b:b + 1, :], axis=1, keepdims=True)
            tot = tot - picked * valid
            cnt = cnt + valid
        # TODO(synk): PyTorch returns NaN when a batch has zero valid rows;
        # we return 0 for that degenerate case (documented divergence).
        return tot * pl.reciprocal(jnp.maximum(cnt, 1.0), approx=True)

    qa_loss = 0.5 * (masked_ce(start_logits, sp_ref) + masked_ce(end_logits, ep_ref))
    loss_ref[0, 0] = qa_loss[0, 0] + kld


def _dis_loss_kernel(labels_ref, dis_ref, w0_ref, b0_ref, w1_ref, b1_ref,
                     w2_ref, b2_ref, loss_ref):
    # Fully fused forward_discriminator: discriminator MLP + log_softmax + NLL.
    log_prob = _disc_log_prob(dis_ref[...], w0_ref[...], b0_ref[...],
                              w1_ref[...], b1_ref[...], w2_ref[...], b2_ref[...])
    B, C = log_prob.shape
    col = jax.lax.broadcasted_iota(jnp.int32, (1, C), 1)
    tot = jnp.zeros((1, 1), jnp.float32)
    for b in range(B):
        onehot = (col == labels_ref[b]).astype(jnp.float32)
        tot = tot - jnp.sum(onehot * log_prob[b:b + 1, :], axis=1, keepdims=True)
    loss_ref[0, 0] = tot[0, 0] * (1.0 / B)                # nn.NLLLoss (mean)


# ------------------------------ call wrappers --------------------------------
def qa_logits_call(h, w_qa, b_qa):
    B, S, _ = h.shape
    return pl.pallas_call(
        _qa_logits_kernel,
        in_specs=[_VMEM(), _VMEM(), _SMEM()],
        out_specs=(_VMEM(), _VMEM()),
        out_shape=(jax.ShapeDtypeStruct((B, S), jnp.float32),
                   jax.ShapeDtypeStruct((B, S), jnp.float32)),
    )(h, w_qa, b_qa)


def qa_total_loss_call(start_pos, end_pos, h, dis_in, w_qa, b_qa,
                       d_w0, d_b0, d_w1, d_b1, d_w2, d_b2, *,
                       dis_lambda, num_classes):
    kernel = functools.partial(_qa_total_loss_kernel,
                               dis_lambda=dis_lambda, num_classes=num_classes)
    loss = pl.pallas_call(
        kernel,
        in_specs=[_SMEM(), _SMEM(), _VMEM(), _VMEM(), _VMEM(), _SMEM(),
                  _VMEM(), _VMEM(), _VMEM(), _VMEM(), _VMEM(), _VMEM()],
        out_specs=_SMEM(),
        out_shape=jax.ShapeDtypeStruct((1, 1), jnp.float32),
    )(start_pos, end_pos, h, dis_in, w_qa, b_qa,
      d_w0, d_b0, d_w1, d_b1, d_w2, d_b2)
    return loss[0, 0]


def dis_loss_call(labels, dis_in, d_w0, d_b0, d_w1, d_b1, d_w2, d_b2):
    loss = pl.pallas_call(
        _dis_loss_kernel,
        in_specs=[_SMEM(), _VMEM(), _VMEM(), _VMEM(), _VMEM(), _VMEM(),
                  _VMEM(), _VMEM()],
        out_specs=_SMEM(),
        out_shape=jax.ShapeDtypeStruct((1, 1), jnp.float32),
    )(labels, dis_in, d_w0, d_b0, d_w1, d_b1, d_w2, d_b2)
    return loss[0, 0]


# --------------------------------- model ------------------------------------
class DomainQAPallas:
    def __init__(self, key, num_classes=NUM_CLASSES, hidden_size=HIDDEN,
                 dis_lambda=DIS_LAMBDA, concat=CONCAT, anneal=ANNEAL):
        self.num_classes = num_classes
        self.hidden = hidden_size
        self.dis_lambda = dis_lambda
        self.concat = concat
        self.anneal = anneal
        self.sep_id = SEP_ID
        input_size = 2 * hidden_size if concat else hidden_size

        ks = jax.random.split(key, 10)
        # TODO(synk): DistilBertModel.from_pretrained has no in-script Pallas
        # equivalent; replaced by a deterministic embedding-table stub below.
        self.tok_emb = 0.02 * jax.random.normal(ks[0], (VOCAB, hidden_size), jnp.float32)
        self.pos_emb = 0.02 * jax.random.normal(ks[1], (SEQ, hidden_size), jnp.float32)

        # qa_outputs: Linear(hidden, 2); weight ~ N(0, 0.02) in PyTorch (out,in)
        # layout, bias = 0.  Row 0 -> start logits, row 1 -> end logits.
        self.qa_w = 0.02 * jax.random.normal(ks[2], (2, hidden_size), jnp.float32)
        self.qa_b = jnp.zeros((2,), jnp.float32)

        def linear_init(kw, kb, fan_in, fan_out):
            bound = 1.0 / math.sqrt(fan_in)
            w = jax.random.uniform(kw, (fan_in, fan_out), jnp.float32, -bound, bound)
            b = jax.random.uniform(kb, (1, fan_out), jnp.float32, -bound, bound)
            return w, b

        self.d_w0, self.d_b0 = linear_init(ks[3], ks[4], input_size, hidden_size)
        self.d_w1, self.d_b1 = linear_init(ks[5], ks[6], hidden_size, hidden_size)
        self.d_w2, self.d_b2 = linear_init(ks[7], ks[8], hidden_size, num_classes)

    # ---- DistilBERT stand-in (XLA glue) ----
    def _bert(self, input_ids, attention_mask):
        tok = self.tok_emb[input_ids]                               # (B, S, H)
        pos = self.pos_emb[None, : input_ids.shape[1], :]           # (1, S, H)
        return (tok + pos) * attention_mask[..., None].astype(jnp.float32)

    def _dis_input(self, input_ids, hidden_state):
        cls_embedding = hidden_state[:, 0]                          # (B, H)
        if self.concat:
            sep_embedding = self.get_sep_embedding(input_ids, hidden_state)
            return jnp.concatenate([cls_embedding, sep_embedding], axis=-1)
        return cls_embedding

    def get_sep_embedding(self, input_ids, sequence_output):
        batch_size = input_ids.shape[0]
        sep_idx = jnp.sum((input_ids == self.sep_id).astype(jnp.int32), axis=1)
        return sequence_output[jnp.arange(batch_size), sep_idx]

    # ---- forward modes ----
    def forward(self, input_ids, attention_mask, start_positions=None,
                end_positions=None, labels=None, dtype=None, global_step=22000):
        if dtype == "qa":
            return self.forward_qa(input_ids, attention_mask,
                                   start_positions, end_positions, global_step)
        elif dtype == "dis":
            assert labels is not None
            return self.forward_discriminator(input_ids, attention_mask, labels)
        else:
            h = self._bert(input_ids, attention_mask)
            # start = qa_outputs channel 0, end = channel 1 — same pairing the
            # reference produces after compute_segment_logits unpacking.
            start_logits, end_logits = qa_logits_call(h, self.qa_w, self.qa_b)
            return start_logits, end_logits

    def forward_qa(self, input_ids, attention_mask, start_positions,
                   end_positions, global_step):
        h = self._bert(input_ids, attention_mask)                   # (B, S, H)
        dis_in = self._dis_input(input_ids, h)                      # (B, Din)
        dis_lambda = self.dis_lambda
        if self.anneal:
            # Reference mutates self.dis_lambda; per-call value is identical.
            dis_lambda = dis_lambda * kl_coef(global_step)
        sp = start_positions.reshape(-1).astype(jnp.int32)          # (B,)
        ep = end_positions.reshape(-1).astype(jnp.int32)            # (B,)
        return qa_total_loss_call(
            sp, ep, h, dis_in, self.qa_w, self.qa_b,
            self.d_w0, self.d_b0, self.d_w1, self.d_b1, self.d_w2, self.d_b2,
            dis_lambda=dis_lambda, num_classes=self.num_classes)

    def forward_discriminator(self, input_ids, attention_mask, labels):
        h = jax.lax.stop_gradient(self._bert(input_ids, attention_mask))
        dis_in = jax.lax.stop_gradient(self._dis_input(input_ids, h))
        return dis_loss_call(labels.reshape(-1).astype(jnp.int32), dis_in,
                             self.d_w0, self.d_b0, self.d_w1, self.d_b1,
                             self.d_w2, self.d_b2)


# ---------------------------------- main -------------------------------------
if __name__ == "__main__":
    key = jax.random.PRNGKey(0)
    k_model, k_ids = jax.random.split(key)
    model = DomainQAPallas(k_model)

    input_ids = jax.random.randint(k_ids, (BATCH, SEQ), 0, VOCAB, dtype=jnp.int32)
    attention_mask = jnp.ones((BATCH, SEQ), dtype=jnp.int32)
    start_positions = jnp.array([1, 3], dtype=jnp.int32)
    end_positions = jnp.array([2, 5], dtype=jnp.int32)
    labels = jnp.array([0, 2], dtype=jnp.int32)

    # default mode: (start_logits, end_logits)
    start_logits, end_logits = model.forward(input_ids, attention_mask)
    # 'qa' mode: scalar total loss (span CE + dis_lambda * KLD), one fused kernel
    qa_loss = model.forward(input_ids, attention_mask,
                            start_positions=start_positions,
                            end_positions=end_positions, dtype="qa")
    # 'dis' mode: scalar NLL loss from discriminator, one fused kernel
    dis_loss = model.forward(input_ids, attention_mask, labels=labels, dtype="dis")

    jax.block_until_ready((start_logits, end_logits, qa_loss, dis_loss))
    assert start_logits.shape == (BATCH, SEQ) and end_logits.shape == (BATCH, SEQ)
    assert qa_loss.shape == () and dis_loss.shape == ()
    assert bool(jnp.isfinite(qa_loss)) and bool(jnp.isfinite(dis_loss))
    print("KERNEL_OK")
</pallas_src>

<mosaic_0001>
module attributes {stable_mosaic.version = 11 : i64} {
  func.func @_qa_logits_kernel(%arg0: memref<2x8x32xf32, #tpu.memory_space<vmem>>, %arg1: memref<2x32xf32, #tpu.memory_space<vmem>>, %arg2: memref<2xf32, #tpu.memory_space<smem>>, %arg3: memref<2x8xf32, #tpu.memory_space<vmem>>, %arg4: memref<2x8xf32, #tpu.memory_space<vmem>>) attributes {dimension_semantics = [], scalar_prefetch = 0 : i64, scratch_operands = 0 : i64, tpu.core_type = #tpu.core_type<tc>} {
    %c0 = arith.constant 0 : index
    %c0_0 = arith.constant 0 : index
    %c0_1 = arith.constant 0 : index
    %0 = vector.load %arg0[%c0, %c0_0, %c0_1] : memref<2x8x32xf32, #tpu.memory_space<vmem>>, vector<2x8x32xf32>
    %c0_2 = arith.constant 0 : index
    %c0_3 = arith.constant 0 : index
    %1 = vector.load %arg1[%c0_2, %c0_3] : memref<2x32xf32, #tpu.memory_space<vmem>>, vector<2x32xf32>
    %c0_4 = arith.constant 0 : index
    %2 = memref.load %arg2[%c0_4] : memref<2xf32, #tpu.memory_space<smem>>
    %c1 = arith.constant 1 : index
    %3 = memref.load %arg2[%c1] : memref<2xf32, #tpu.memory_space<smem>>
    %4 = vector.extract_strided_slice %1 {offsets = [0, 0], sizes = [1, 32], strides = [1, 1]} : vector<2x32xf32> to vector<1x32xf32>
    %5 = vector.shape_cast %4 : vector<1x32xf32> to vector<1x1x32xf32>
    %6 = vector.extract_strided_slice %1 {offsets = [1, 0], sizes = [1, 32], strides = [1, 1]} : vector<2x32xf32> to vector<1x32xf32>
    %7 = vector.shape_cast %6 : vector<1x32xf32> to vector<1x1x32xf32>
    %8 = vector.broadcast %5 : vector<1x1x32xf32> to vector<2x8x32xf32>
    %9 = arith.mulf %0, %8 : vector<2x8x32xf32>
    %cst = arith.constant dense<0.000000e+00> : vector<2x8xf32>
    %10 = vector.multi_reduction <add>, %9, %cst [2] : vector<2x8x32xf32> to vector<2x8xf32>
    %11 = vector.broadcast %2 : f32 to vector<2x8xf32>
    %12 = arith.addf %10, %11 : vector<2x8xf32>
    %13 = vector.broadcast %7 : vector<1x1x32xf32> to vector<2x8x32xf32>
    %14 = arith.mulf %0, %13 : vector<2x8x32xf32>
    %cst_5 = arith.constant dense<0.000000e+00> : vector<2x8xf32>
    %15 = vector.multi_reduction <add>, %14, %cst_5 [2] : vector<2x8x32xf32> to vector<2x8xf32>
    %16 = vector.broadcast %3 : f32 to vector<2x8xf32>
    %17 = arith.addf %15, %16 : vector<2x8xf32>
    %c0_6 = arith.constant 0 : index
    %c0_7 = arith.constant 0 : index
    %18 = vector.load %arg3[%c0_6, %c0_7] : memref<2x8xf32, #tpu.memory_space<vmem>>, vector<2x8xf32>
    tpu.vector_store %arg3[%c0_6, %c0_7], %12 {strides = array<i32>} : memref<2x8xf32, #tpu.memory_space<vmem>>, vector<2x8xf32>,
    %c0_8 = arith.constant 0 : index
    %c0_9 = arith.constant 0 : index
    %19 = vector.load %arg4[%c0_8, %c0_9] : memref<2x8xf32, #tpu.memory_space<vmem>>, vector<2x8xf32>
    tpu.vector_store %arg4[%c0_8, %c0_9], %17 {strides = array<i32>} : memref<2x8xf32, #tpu.memory_space<vmem>>, vector<2x8xf32>,
    return
  }
}

</mosaic_0001>

<bundles_post_ra>
// kernel: tpu_custom_call.1
= control target key start
LH: loop header
LB: loop body
LE: loop exit
PB: predicated region body
PF: predicated region fallthrough
CT: control target
= control target key end

     0   :  { %10 = vsyncpa [#allocation3], 0  ;;  %s319_s0 = inlined_call_operand.hbm [shape: f32[2,8,32], index: 0, kind: input, shape index: {}]   ;;  %s320_s1 = inlined_call_operand.hbm [shape: f32[2,32], index: 1, kind: input, shape index: {}]   ;;  %s321_s2 = inlined_call_operand.vmem [shape: f32[2], index: 2, kind: input, shape index: {}]   ;;  %s322_s3 = inlined_call_operand.hbm [shape: f32[2,8], index: 3, kind: output, shape index: {0}]   ;;  %s323_s4 = inlined_call_operand.hbm [shape: f32[2,8], index: 4, kind: output, shape index: {1}]  }
   0x1   :  { %11 = vsyncpa [#allocation7], 0 }
   0x2   :  { %12 = vsyncpa [#allocation5], 0 }
   0x3   :  { %13 = vsyncpa [#allocation4], 0 }
   0x4   :  { %14 = vsyncpa [#allocation11], 0  ;;  %s19_s17 = sshll.u32 %s319_s0, 4  ;;  %s270_s18 = smov [#allocation2]   ;;  %s20_s17 = int_to_ptr.hbm [resolvable:$true] %s19_s17 }
   0x5   :  { %s21_s19 = sshll.u32 %s270_s18, 4  ;;  %s33_s22 = sshll.u32 %s320_s1, 4  ;;  %s22_s19 = int_to_ptr.vmem [resolvable:$true] %s21_s19  ;;  %s34_s22 = int_to_ptr.hbm [resolvable:$true] %s33_s22 }
   0x6   :  { %s271_s23 = smov 128   ;;  %s272_s24 = smov 8  }
   0x7   :  { %27 = dma.hbm_to_vmem [thread:$0]  %s20_s17, 256, %s22_s19, [#allocation3], %s271_s23, %s271_s23, %s272_s24  }
   0x8   :  { %s273_s25 = smov [#allocation6]   ;;  %s44_s29 = sshll.u32 %s321_s2, 4  ;;  %s45_s29 = int_to_ptr.vmem [resolvable:$true] %s44_s29 }
   0x9   :  { %s35_s26 = sshll.u32 %s273_s25, 4  ;;  %s274_s0 = smov [#allocation8]   ;;  %s36_s26 = int_to_ptr.vmem [resolvable:$true] %s35_s26 }
   0xa   :  { %38 = dma.hbm_to_vmem [thread:$0]  %s34_s22, 32, %s36_s26, [#allocation7]  }
   0xb   :  { %47 = dma.vmem_to_smem %s45_s29, 16, %s274_s0, [#allocation5]  }
   0xc   :  { %260 = dma.done.wait [#allocation3], 256  }
   0xd   :  { %261 = vsyncadd [#allocation3], 4294967040 }
   0xe   :  { %262 = dma.done.wait [#allocation7], 32  }
   0xf   :  { %263 = vsyncadd [#allocation7], 4294967264 }
  0x10   :  { %264 = dma.done.wait [#allocation5], 16  }
  0x11   :  { %265 = vsyncadd [#allocation5], 4294967280 }
  0x12   :  { %60 = sfence }
  0x13   :  { %v61_v0 = vld [vmem:[#allocation2] sm:$0xff]  ;;  %v63_v1 = vld [vmem:[#allocation6] sm:$0x3]  ;;  %vm69_vm0 = vcmask 261120   ;;  %v62_v6 = vld [vmem:[#allocation2 + $0x8] sm:$0xff]  ;;  %s144_s1 = sld [smem:[#allocation8 + $0x1]]  ;;  %v93_v15 = vlaneseq }
  0x14   :  { %v79_v2 = vperm.slane %v63_v1, 1  ;;  %v66_v3 = vperm.slane %v63_v1, 0  ;;  %s64_s2 = sld [smem:[#allocation8]]  ;;  %s275_s30 = smov [#allocation9]   ;;  %vm97_vm1 = vcmask 1041409   ;;  %vm100_vm2 = vcmask 58368  }
  0x15   :  { %v94_v18 = vand.u32 127, %v93_v15  ;;  %s114_s5 = sshll.u32 %s275_s30, 4  ;;  %s116_s8 = sshll.u32 %s322_s3, 4  ;;  %s115_s5 = int_to_ptr.vmem [resolvable:$true] %s114_s5  ;;  %s117_s8 = int_to_ptr.hbm [resolvable:$true] %s116_s8 }
  0x16   :  { %v80_v4 = vmul.f32 %v79_v2, %v61_v0  ;;  %v67_v5 = vmul.f32 %v66_v3, %v61_v0  ;;  %v81_v9 = vmul.f32 %v79_v2, %v62_v6  ;;  %v68_v10 = vmul.f32 %v66_v3, %v62_v6  ;;  %s276_s9 = smov [#allocation10]   ;;  %s127_s13 = sshll.u32 %s323_s4, 4  ;;  %s128_s13 = int_to_ptr.hbm [resolvable:$true] %s127_s13 }
  0x17   :  { %s125_s10 = sshll.u32 %s276_s9, 4  ;;  %s126_s10 = int_to_ptr.vmem [resolvable:$true] %s125_s10 }
  0x18   :  { %v82_v7 = vsel %vm69_vm0, %v80_v4, 0.0  ;;  %v70_v8 = vsel %vm69_vm0, %v67_v5, 0.0  ;;  %v85_v11 = vsel %vm69_vm0, %v81_v9, 0.0  ;;  %v73_v12 = vsel %vm69_vm0, %v68_v10, 0.0 }
  0x19   :  { %83 = vadd.xlane.f32.xlu1 %v82_v7  ;;  %71 = vadd.xlane.f32.xlu0 %v70_v8  ;;  %v88_v16 = vstv %s144_s1 }
  0x1a   :  { %v76_v17 = vstv %s64_s2 }
  0x21   :  { %86 = vadd.xlane.f32.xlu1 %v85_v11  ;;  %74 = vadd.xlane.f32.xlu0 %v73_v12 }
  0x8c   :  { %v84_v13 = vpop.xlane.xlu1 %83  ;;  %v72_v14 = vpop.xlane.xlu0 %71 }
  0x8d   :  { %v89_v19 = vadd.f32 %v88_v16, %v84_v13  ;;  %v77_v20 = vadd.f32 %v76_v17, %v72_v14 }
  0x8f   :  { %v104_v25 = vperm.slane %v89_v19, %v94_v18  ;;  %v95_v26 = vperm.slane %v77_v20, %v94_v18 }
  0x94   :  { %v87_v21 = vpop.xlane.xlu1 %86  ;;  %v75_v22 = vpop.xlane.xlu0 %74 }
  0x95   :  { %v90_v23 = vadd.f32 %v88_v16, %v87_v21  ;;  %v78_v24 = vadd.f32 %v76_v17, %v75_v22 }
  0x97   :  { %v105_v27 = vperm.slane %v90_v23, %v94_v18  ;;  %v96_v28 = vperm.slane %v78_v24, %v94_v18 }
  0x99   :  { %v98_v29 = vsel %vm97_vm1, %v96_v28, %v95_v26  ;;  %v106_v30 = vsel %vm97_vm1, %v105_v27, %v104_v25 }
  0x9a   :  { %101 = vst.msk [vmem:[#allocation9] sm:$0x3] %vm100_vm2, %v98_v29 }
  0x9b   :  { %119 = dma.vmem_to_hbm [thread:$0]  %s115_s5, 32, %s117_s8, [#allocation4]   ;;  %108 = vst.msk [vmem:[#allocation10] sm:$0x3] %vm100_vm2, %v106_v30 }
  0x9c   :  { %130 = dma.vmem_to_hbm [thread:$0]  %s126_s10, 32, %s128_s13, [#allocation11]  }
  0x9d   :  { %266 = dma.done.wait [#allocation4], 32  }
  0x9e   :  { %267 = vsyncadd [#allocation4], 4294967264 }
  0x9f   :  { %268 = dma.done.wait [#allocation11], 32  }
  0xa0   :  { %269 = vsyncadd [#allocation11], 4294967264 }
  0xa1   :  { %139 = vsyncpa [#allocation3], 1 }
  0xa2   :  { %140 = vsyncpa [#allocation7], 1 }
  0xa3   :  { %141 = vsyncpa [#allocation4], 1 }
  0xa4   :  { %142 = vsyncpa [#allocation11], 1 }
  0xa5   :  { %143 = vsyncpa [#allocation5], 1 }

</bundles_post_ra>
